<compile_context>
chip_gen: v6e
topology: v6e:2x2x1
jax: 0.10.0
libtpu: 0.0.40
codegen_flags: <defaults>
</compile_context>

<pallas_src>
from functools import partial

import numpy as np
import jax
import jax.numpy as jnp
from jax.experimental import pallas as pl
from jax.experimental.pallas import tpu as pltpu


_G = 8                             # logical rows packed per kernel row
_MAX_TM = 16384                    # packed-row tile cap (~19 MiB dbl-buffered I/O)
_MIN_STEPS = 4                     # >=4 grid steps when rows permit (v7x: 2 TCs)
_VMEM_LIMIT = 48 * 1024 * 1024     # scoped-VMEM window (under v7x 64 MiB physical)


# ---------------------------------------------------------------------------
# Pallas kernel
# ---------------------------------------------------------------------------
def _features_scaling_kernel(*refs, has_bias):
    # x:    (TM, G*D_IN)        row tile (G logical rows packed per lane-row)
    # w12:  (G*D_IN, G*D_OUT)   block-diag of (mat_1.T @ mat_2.T) / std
    # w1s:  (G*D_IN, G*4)       block-diag of mat_1.T[:, sel]
    # w2s:  (G*4,  G*D_OUT)     block-diag of mat_2.T[sel, :] / std
    # div/cst: (1, G*4)         divider / const for the selected columns
    # bias: (1, G*D_OUT)        average / std (only when nonzero)
    if has_bias:
        x_ref, w12_ref, w1s_ref, w2s_ref, div_ref, cst_ref, bias_ref, o_ref = refs
    else:
        x_ref, w12_ref, w1s_ref, w2s_ref, div_ref, cst_ref, o_ref = refs
        bias_ref = None

    x = x_ref[...].astype(jnp.float32)          # in-kernel cast (no wrapper astype)
    hs = jnp.dot(x, w1s_ref[...], preferred_element_type=jnp.float32)
    # true divide inside floor (reciprocal-mul could flip floor at exact multiples)
    delta = (jnp.floor(hs / div_ref[...]) + cst_ref[...]) - hs
    y = jnp.dot(x, w12_ref[...], preferred_element_type=jnp.float32)
    y = y + jnp.dot(delta, w2s_ref[...], preferred_element_type=jnp.float32)
    if bias_ref is not None:
        y = y - bias_ref[...]
    o_ref[...] = y


# ---------------------------------------------------------------------------
# Host-side helpers
# ---------------------------------------------------------------------------
def _block_diag(mat, g):
    r, c = mat.shape
    out = np.zeros((g * r, g * c), dtype=np.float32)
    for i in range(g):
        out[i * r:(i + 1) * r, i * c:(i + 1) * c] = mat
    return out


def _round_up(a, b):
    return ((a + b - 1) // b) * b


def _choose_tile(rows, max_tm=_MAX_TM, min_steps=_MIN_STEPS):
    """Big tiles to amortize per-step overhead; keep >= min_steps steps when
    rows permit (megacore sharding on v7x needs >=2 steps per TensorCore)."""
    if rows <= 32:
        return rows                         # single full block (no 8-alignment needed)
    tm = _round_up(-(-rows // min_steps), 8)
    return max(8, min(max_tm, tm))


@partial(jax.jit, static_argnames=("g", "tm", "d_out", "has_bias"))
def _forward(x, w12, w1s, w2s, div, cst, bias, *, g, tm, d_out, has_bias):
    lead = x.shape[:-1]
    d_in = x.shape[-1]
    n = int(np.prod(lead)) if lead else 1

    pad = (-n) % g
    n_pad = n + pad
    rows = n_pad // g
    d_in_p = g * d_in
    d_out_p = g * d_out
    d_sel_p = g * 4

    # flatten (free row-major view); pad <= g-1 zero rows only when needed
    xf = x.reshape(n, d_in)
    if pad:
        xf = jnp.pad(xf, ((0, pad), (0, 0)))
    xp = xf.reshape(rows, d_in_p)            # free view: pack G logical rows per row

    kernel = partial(_features_scaling_kernel, has_bias=has_bias)
    full = lambda i: (0, 0)
    in_specs = [
        pl.BlockSpec((tm, d_in_p), lambda i: (i, 0)),
        pl.BlockSpec((d_in_p, d_out_p), full),
        pl.BlockSpec((d_in_p, d_sel_p), full),
        pl.BlockSpec((d_sel_p, d_out_p), full),
        pl.BlockSpec((1, d_sel_p), full),
        pl.BlockSpec((1, d_sel_p), full),
    ]
    operands = [xp, w12, w1s, w2s, div, cst]
    if has_bias:
        in_specs.append(pl.BlockSpec((1, d_out_p), full))
        operands.append(bias)

    cost = pl.CostEstimate(
        flops=2 * n_pad * (d_in * (d_out + 4) + 4 * d_out),
        transcendentals=0,
        bytes_accessed=rows * d_in_p * xp.dtype.itemsize + rows * d_out_p * 4,
    )

    out = pl.pallas_call(
        kernel,
        out_shape=jax.ShapeDtypeStruct((rows, d_out_p), jnp.float32),
        grid=(pl.cdiv(rows, tm),),
        in_specs=in_specs,
        out_specs=pl.BlockSpec((tm, d_out_p), lambda i: (i, 0)),
        compiler_params=pltpu.CompilerParams(
            dimension_semantics=("parallel",),
            vmem_limit_bytes=_VMEM_LIMIT),
        cost_estimate=cost,
    )(*operands)

    # free view reshape back: (rows, G*D_OUT) -> (N_pad, D_OUT) -> (..., D_OUT)
    out = out.reshape(n_pad, d_out)
    if pad:
        out = out[:n]
    return out.reshape(*lead, d_out)


# ---------------------------------------------------------------------------
# Module wrapper
# ---------------------------------------------------------------------------
class FeaturesAndScaling:

    def __init__(self, threshold, freq_ech, type='source'):
        self.threshold = float(threshold)
        self.freq_ech = float(freq_ech)
        self.type = type
        t, f = self.threshold, self.freq_ech

        if type == 'source':
            mat_1 = np.array(
                [[1, 0, 0, 0, 0], [1, 0, 0, 0, 0], [1, 1, 0, 0, 0],
                 [1, 1, 0, 0, 0], [0, 1, 0, 0, 0], [0, 0, 1, 0, 0],
                 [0, 0, 0, 1, 0], [0, 0, 0, 0, 1],
                 [0, 0, 0, 0.5, 0.5], [0, 0, 0, -0.5, -0.5]], dtype=np.float32)
            mat_2 = np.array(
                [[1, 0, 0, 0, 0, 0, 0, 0, 0, 0],
                 [0, 1, 0, 0, 0, 0, 0, 0, 0, 0],
                 [1, -t, 0, 0, 0, 0, 0, 0, 0, 0],
                 [0, 0, 1, 0, 0, 0, 0, 0, 0, 0],
                 [0, 0, 0, 1, 0, 0, 0, 0, 0, 0],
                 [0, 0, 1, -t, 0, 0, 0, 0, 0, 0],
                 [0, 0, 0, 0, 1, 0, 0, 0, 0, 0],
                 [0, 0, 0, 0, 0, 1, 0, 0, 0, 0],
                 [0, 0, 0, 0, 0, 0, 1, 0, 0, 0],
                 [0, 0, 0, 0, 0, 0, 0, 1, 0, 0],
                 [0, 0, 0, 0, 0, 0, 0.5, 0.5, 0, 0],
                 [0, 0, 0, 0, 0, 0, 0.5, 0.5, -f, 0],
                 [0, 0, 0, 0, 0, 0, -0.5, -0.5, 0, -f],
                 [0, 0, 0, 0, 0, 0, 0.5, -0.5, 0, 0]], dtype=np.float32)
            n_out = 14
        elif type == 'target':
            mat_1 = np.array(
                [[1, 0, 0, 0, 0, 0, 0, 0], [1, 0, 0, 0, 0, 0, 0, 0],
                 [1, 1, 0, 0, 0, 0, 0, 0], [1, 1, 0, 0, 0, 0, 0, 0],
                 [0, 1, 0, 0, 0, 0, 0, 0], [0, 0, 1, 0, 0, 0, 0, 0],
                 [0, 0, 0, 1, 0, 0, 0, 0], [0, 0, 0, 0, 1, 0, 0, 0],
                 [0, 0, 0, 0.5, 0.5, 0, 0, 0], [0, 0, 0, -0.5, -0.5, 0, 0, 0],
                 [0, 0, 0, 0, 0, 1, 0, 0], [0, 0, 0, 0, 0, 0, 1, 0],
                 [0, 0, 0, 0, 0, 0, 0, 1]], dtype=np.float32)
            mat_2 = np.array(
                [[1, 0, 0, 0, 0, 0, 0, 0, 0, 0, 0, 0, 0],
                 [0, 1, 0, 0, 0, 0, 0, 0, 0, 0, 0, 0, 0],
                 [1, -t, 0, 0, 0, 0, 0, 0, 0, 0, 0, 0, 0],
                 [0, 0, 1, 0, 0, 0, 0, 0, 0, 0, 0, 0, 0],
                 [0, 0, 0, 1, 0, 0, 0, 0, 0, 0, 0, 0, 0],
                 [0, 0, 1, -t, 0, 0, 0, 0, 0, 0, 0, 0, 0],
                 [0, 0, 0, 0, 1, 0, 0, 0, 0, 0, 0, 0, 0],
                 [0, 0, 0, 0, 0, 1, 0, 0, 0, 0, 0, 0, 0],
                 [0, 0, 0, 0, 0, 0, 1, 0, 0, 0, 0, 0, 0],
                 [0, 0, 0, 0, 0, 0, 0, 1, 0, 0, 0, 0, 0],
                 [0, 0, 0, 0, 0, 0, 0.5, 0.5, 0, 0, 0, 0, 0],
                 [0, 0, 0, 0, 0, 0, 0.5, 0.5, -f, 0, 0, 0, 0],
                 [0, 0, 0, 0, 0, 0, -0.5, -0.5, 0, -f, 0, 0, 0],
                 [0, 0, 0, 0, 0, 0, 0.5, -0.5, 0, 0, 0, 0, 0],
                 [0, 0, 0, 0, 0, 0, 0, 0, 0, 0, 1, 0, 0],
                 [0, 0, 0, 0, 0, 0, 0, 0, 0, 0, 0, 1, 0],
                 [0, 0, 0, 0, 0, 0, 0, 0, 0, 0, 0, 0, 1]], dtype=np.float32)
            n_out = 17
        else:
            raise ValueError(type)

        self.mat_1 = mat_1                       # (D_MID, D_IN)
        self.mat_2 = mat_2                       # (D_OUT, D_MID)
        self.d_in = mat_1.shape[1]
        self.d_mid = mat_1.shape[0]
        self.d_out = mat_2.shape[0]

        # buffers from __init__ (weights=None path): zeros / ones
        self.average = np.zeros((n_out,), dtype=np.float32)
        self.std = np.ones((n_out,), dtype=np.float32)

        # --- folded / algebraically simplified parameters ------------------
        sel = np.array([1, 3, 8, 9], dtype=np.int64)
        w1 = mat_1.T.astype(np.float32)                        # (D_IN, D_MID)
        w2 = (mat_2.T / self.std[None, :]).astype(np.float32)  # (D_MID, D_OUT)
        self._w12 = (w1 @ w2).astype(np.float32)               # (D_IN, D_OUT)
        self._w1_sel = np.ascontiguousarray(w1[:, sel])        # (D_IN, 4)
        self._w2_sel = np.ascontiguousarray(w2[sel, :])        # (4, D_OUT)
        self._div4 = np.array([t, t, f, f], dtype=np.float32)
        self._cst4 = np.array([1, 1, 0, 0], dtype=np.float32)
        self._bias = (self.average / self.std).astype(np.float32)
        self._has_bias = bool(np.any(self._bias != 0.0))       # default init: False
        self._packed = {}                                      # per-G cache

    def _get_packed(self, g):
        if g not in self._packed:
            self._packed[g] = dict(
                w12=jnp.asarray(_block_diag(self._w12, g)),
                w1s=jnp.asarray(_block_diag(self._w1_sel, g)),
                w2s=jnp.asarray(_block_diag(self._w2_sel, g)),
                div=jnp.asarray(np.tile(self._div4, g))[None, :],
                cst=jnp.asarray(np.tile(self._cst4, g))[None, :],
                bias=jnp.asarray(np.tile(self._bias, g))[None, :],
            )
        return self._packed[g]

    def __call__(self, x):
        lead = x.shape[:-1]
        n = int(np.prod(lead)) if lead else 1
        if n == 0:
            return jnp.zeros((*lead, self.d_out), jnp.float32)

        g = _G                                   # always pack at G=8 (pad <=7 rows)
        rows = _round_up(n, g) // g
        tm = _choose_tile(rows)
        p = self._get_packed(g)
        return _forward(x, p["w12"], p["w1s"], p["w2s"],
                        p["div"], p["cst"], p["bias"],
                        g=g, tm=tm, d_out=self.d_out, has_bias=self._has_bias)

    # pure-JAX reference (mirrors the PyTorch forward exactly)
    def reference(self, x):
        t, f = self.threshold, self.freq_ech
        h = jnp.matmul(x.astype(jnp.float32), jnp.asarray(self.mat_1.T),
                       precision=jax.lax.Precision.HIGHEST)
        divider = jnp.asarray([t, t, f, f], dtype=jnp.float32)
        const = jnp.asarray([1.0, 1.0, 0.0, 0.0], dtype=jnp.float32)
        cols = jnp.asarray([1, 3, 8, 9])
        upd = jnp.floor(h[..., cols] / divider) + const
        h = h.at[..., cols].set(upd)
        y = jnp.matmul(h, jnp.asarray(self.mat_2.T),
                       precision=jax.lax.Precision.HIGHEST)
        return (y - jnp.asarray(self.average)) / jnp.asarray(self.std)


if __name__ == "__main__":
    mod = FeaturesAndScaling(threshold=0.5, freq_ech=100.0, type='source')

    # primary check: N=16 rows -> packed G=8 path, exact multiple of 8
    x = jax.random.normal(jax.random.PRNGKey(0), (2, 8, 5), dtype=jnp.float32) * 3.0
    out = jax.block_until_ready(mod(x))
    ref = jax.block_until_ready(mod.reference(x))
    assert out.shape == (2, 8, 14), out.shape
    np.testing.assert_allclose(np.asarray(out), np.asarray(ref),
                               rtol=1e-4, atol=1e-4)

    # secondary check: N=75 (not a multiple of 8) -> zero-pad path, still G=8
    x2 = jax.random.normal(jax.random.PRNGKey(1), (3, 5, 5), dtype=jnp.float32) * 3.0
    out2 = jax.block_until_ready(mod(x2))
    ref2 = jax.block_until_ready(mod.reference(x2))
    assert out2.shape == (3, 5, 14), out2.shape
    np.testing.assert_allclose(np.asarray(out2), np.asarray(ref2),
                               rtol=1e-4, atol=1e-4)

    # tertiary check: multi-step grid with a ragged final row block
    x3 = jax.random.normal(jax.random.PRNGKey(2), (1, 1000, 5), dtype=jnp.float32) * 3.0
    out3 = jax.block_until_ready(mod(x3))
    ref3 = jax.block_until_ready(mod.reference(x3))
    assert out3.shape == (1, 1000, 14), out3.shape
    np.testing.assert_allclose(np.asarray(out3), np.asarray(ref3),
                               rtol=1e-4, atol=1e-4)

    print("KERNEL_OK")
</pallas_src>

<mosaic_0001>
module attributes {stable_mosaic.version = 11 : i64} {
  func.func @_features_scaling_kernel(%arg0: i32, %arg1: memref<2x40xf32, #tpu.memory_space<vmem>>, %arg2: memref<40x112xf32, #tpu.memory_space<vmem>>, %arg3: memref<40x32xf32, #tpu.memory_space<vmem>>, %arg4: memref<32x112xf32, #tpu.memory_space<vmem>>, %arg5: memref<1x32xf32, #tpu.memory_space<vmem>>, %arg6: memref<1x32xf32, #tpu.memory_space<vmem>>, %arg7: memref<2x112xf32, #tpu.memory_space<vmem>>) attributes {dimension_semantics = [#tpu.dimension_semantics<parallel>], iteration_bounds = array<i64: 1>, scalar_prefetch = 0 : i64, scratch_operands = 0 : i64, tpu.core_type = #tpu.core_type<tc>, window_params = [{transform_indices = @transform_0, window_bounds = array<i64: 2, 40>}, {pipeline_mode = #tpu.pipeline_mode<synchronous>, transform_indices = @transform_1, window_bounds = array<i64: 40, 112>}, {pipeline_mode = #tpu.pipeline_mode<synchronous>, transform_indices = @transform_2, window_bounds = array<i64: 40, 32>}, {pipeline_mode = #tpu.pipeline_mode<synchronous>, transform_indices = @transform_3, window_bounds = array<i64: 32, 112>}, {pipeline_mode = #tpu.pipeline_mode<synchronous>, transform_indices = @transform_4, window_bounds = array<i64: 1, 32>}, {pipeline_mode = #tpu.pipeline_mode<synchronous>, transform_indices = @transform_5, window_bounds = array<i64: 1, 32>}, {transform_indices = @transform_6, window_bounds = array<i64: 2, 112>}]} {
    %c0 = arith.constant 0 : index
    %c0_0 = arith.constant 0 : index
    %0 = vector.load %arg1[%c0, %c0_0] : memref<2x40xf32, #tpu.memory_space<vmem>>, vector<2x40xf32>
    %c0_1 = arith.constant 0 : index
    %c0_2 = arith.constant 0 : index
    %1 = vector.load %arg3[%c0_1, %c0_2] : memref<40x32xf32, #tpu.memory_space<vmem>>, vector<40x32xf32>
    %cst = arith.constant dense<0.000000e+00> : vector<2x32xf32>
    %2 = tpu.matmul %0, %1, %cst {dimension_numbers = #tpu.dot_dimension_numbers<[1], [0], [0], [1], [0, 0, 1, 1], [], []>} : vector<2x40xf32>, vector<40x32xf32>, vector<2x32xf32> -> vector<2x32xf32>
    %c0_3 = arith.constant 0 : index
    %c0_4 = arith.constant 0 : index
    %3 = vector.load %arg5[%c0_3, %c0_4] : memref<1x32xf32, #tpu.memory_space<vmem>>, vector<1x32xf32>
    %4 = vector.broadcast %3 : vector<1x32xf32> to vector<2x32xf32>
    %5 = arith.divf %2, %4 : vector<2x32xf32>
    %6 = math.floor %5 : vector<2x32xf32>
    %c0_5 = arith.constant 0 : index
    %c0_6 = arith.constant 0 : index
    %7 = vector.load %arg6[%c0_5, %c0_6] : memref<1x32xf32, #tpu.memory_space<vmem>>, vector<1x32xf32>
    %8 = vector.broadcast %7 : vector<1x32xf32> to vector<2x32xf32>
    %9 = arith.addf %6, %8 : vector<2x32xf32>
    %10 = arith.subf %9, %2 : vector<2x32xf32>
    %c0_7 = arith.constant 0 : index
    %c0_8 = arith.constant 0 : index
    %11 = vector.load %arg2[%c0_7, %c0_8] : memref<40x112xf32, #tpu.memory_space<vmem>>, vector<40x112xf32>
    %cst_9 = arith.constant dense<0.000000e+00> : vector<2x112xf32>
    %12 = tpu.matmul %0, %11, %cst_9 {dimension_numbers = #tpu.dot_dimension_numbers<[1], [0], [0], [1], [0, 0, 1, 1], [], []>} : vector<2x40xf32>, vector<40x112xf32>, vector<2x112xf32> -> vector<2x112xf32>
    %c0_10 = arith.constant 0 : index
    %c0_11 = arith.constant 0 : index
    %13 = vector.load %arg4[%c0_10, %c0_11] : memref<32x112xf32, #tpu.memory_space<vmem>>, vector<32x112xf32>
    %cst_12 = arith.constant dense<0.000000e+00> : vector<2x112xf32>
    %14 = tpu.matmul %10, %13, %cst_12 {dimension_numbers = #tpu.dot_dimension_numbers<[1], [0], [0], [1], [0, 0, 1, 1], [], []>} : vector<2x32xf32>, vector<32x112xf32>, vector<2x112xf32> -> vector<2x112xf32>
    %15 = arith.addf %12, %14 : vector<2x112xf32>
    %c0_13 = arith.constant 0 : index
    %c0_14 = arith.constant 0 : index
    %16 = vector.load %arg7[%c0_13, %c0_14] : memref<2x112xf32, #tpu.memory_space<vmem>>, vector<2x112xf32>
    tpu.vector_store %arg7[%c0_13, %c0_14], %15 {strides = array<i32>} : memref<2x112xf32, #tpu.memory_space<vmem>>, vector<2x112xf32>,
    return
  }
  func.func @transform_0(%arg0: i32) -> (i32, i32) {
    %c0_i32 = arith.constant 0 : i32
    %c0_i32_0 = arith.constant 0 : i32
    return %arg0, %c0_i32 : i32, i32
  }
  func.func @transform_1(%arg0: i32) -> (i32, i32) {
    %c0_i32 = arith.constant 0 : i32
    %c0_i32_0 = arith.constant 0 : i32
    %c0_i32_1 = arith.constant 0 : i32
    return %c0_i32, %c0_i32_0 : i32, i32
  }
  func.func @transform_2(%arg0: i32) -> (i32, i32) {
    %c0_i32 = arith.constant 0 : i32
    %c0_i32_0 = arith.constant 0 : i32
    %c0_i32_1 = arith.constant 0 : i32
    return %c0_i32, %c0_i32_0 : i32, i32
  }
  func.func @transform_3(%arg0: i32) -> (i32, i32) {
    %c0_i32 = arith.constant 0 : i32
    %c0_i32_0 = arith.constant 0 : i32
    %c0_i32_1 = arith.constant 0 : i32
    return %c0_i32, %c0_i32_0 : i32, i32
  }
  func.func @transform_4(%arg0: i32) -> (i32, i32) {
    %c0_i32 = arith.constant 0 : i32
    %c0_i32_0 = arith.constant 0 : i32
    %c0_i32_1 = arith.constant 0 : i32
    return %c0_i32, %c0_i32_0 : i32, i32
  }
  func.func @transform_5(%arg0: i32) -> (i32, i32) {
    %c0_i32 = arith.constant 0 : i32
    %c0_i32_0 = arith.constant 0 : i32
    %c0_i32_1 = arith.constant 0 : i32
    return %c0_i32, %c0_i32_0 : i32, i32
  }
  func.func @transform_6(%arg0: i32) -> (i32, i32) {
    %c0_i32 = arith.constant 0 : i32
    %c0_i32_0 = arith.constant 0 : i32
    return %arg0, %c0_i32 : i32, i32
  }
}

</mosaic_0001>

<bundles_post_ra>
// kernel: _forward.1
= control target key start
LH: loop header
LB: loop body
LE: loop exit
PB: predicated region body
PF: predicated region fallthrough
CT: control target
= control target key end

     0   :  { %v344_v0 = vmov 0.0   ;;  %vm345_vm0 = vmmov 0   ;;  %vm29_vm1 = vcmask 326656   ;;  %vm131_vm2 = vcmask 261120   ;;  %s457_s2 = inlined_call_operand.vmem [shape: f32[40,32], index: 2, kind: input, shape index: {}]   ;;  %s458_s0 = inlined_call_operand.vmem [shape: f32[2,40], index: 0, kind: input, shape index: {}]   ;;  %s459_s3 = inlined_call_operand.vmem [shape: f32[32,112], index: 3, kind: input, shape index: {}]   ;;  %s460_s4 = inlined_call_operand.vmem [shape: f32[1,32], index: 4, kind: input, shape index: {}]   ;;  %s461_s5 = inlined_call_operand.vmem [shape: f32[1,32], index: 5, kind: input, shape index: {}]   ;;  %s462_s1 = inlined_call_operand.vmem [shape: f32[40,112], index: 1, kind: input, shape index: {}]   ;;  %s463_s6 = inlined_call_operand.vmem [shape: f32[2,112], index: 6, kind: output, shape index: {}]  }
   0x1   :  { %303 = vmatprep.subr.mxu0 %v344_v0  ;;  %v28_v1 = vld [vmem:[%s457_s2 + $0x20] sm:$0xff]  ;;  %v27_v2 = vld [vmem:[%s457_s2 + $0x18] sm:$0xff]  ;;  %313 = vmatprep.mubr.msk.f32.mxu0 %vm345_vm0, %v344_v0  ;;  %v26_v3 = vld [vmem:[%s457_s2 + $0x10] sm:$0xff]  ;;  %vm275_vm3 = vcmask 910336  }
   0x2   :  { %304 = vmatpush3.msra.mxu0 %v28_v1  ;;  %316 = vmatprep.subr.mxu1 %v344_v0  ;;  %v25_v4 = vld [vmem:[%s457_s2 + $0x8] sm:$0xff]  ;;  %v24_v5 = vld [vmem:[%s457_s2] sm:$0xff]  ;;  %v130_v7 = vld [vmem:[%s459_s3 + $0x18] sm:$0xff] }
   0x3   :  { %305 = vmatprep.subr.mxu0 %v344_v0  ;;  %324 = vmatprep.mubr.msk.f32.mxu1 %vm345_vm0, %v344_v0  ;;  %v23_v6 = vld [vmem:[%s458_s0] sm:$0x3]  ;;  %v129_v8 = vld [vmem:[%s459_s3 + $0x10] sm:$0xff]  ;;  %v128_v9 = vld [vmem:[%s459_s3 + $0x8] sm:$0xff] }
   0x4   :  { %306 = vmatpush3.msra.mxu0 %v27_v2  ;;  %317 = vmatpush3.msra.mxu1 %v130_v7  ;;  %v127_v10 = vld [vmem:[%s459_s3] sm:$0xff]  ;;  %v125_v21 = vld [vmem:[%s462_s1 + $0x18] sm:$0xff]  ;;  %v124_v22 = vld [vmem:[%s462_s1 + $0x10] sm:$0xff] }
   0x5   :  { %307 = vmatprep.subr.mxu0 %v344_v0  ;;  %318 = vmatprep.subr.mxu1 %v344_v0  ;;  %v282_v11 = vld [vmem:[%s460_s4] ss:$0 sm:$0xff]  ;;  %v123_v23 = vld [vmem:[%s462_s1 + $0x8] sm:$0xff] }
   0x6   :  { %308 = vmatpush3.msra.mxu0 %v26_v3  ;;  %319 = vmatpush3.msra.mxu1 %v129_v8  ;;  %342 = vrcp.f32 %v282_v11  ;;  %v283_v15 = vld [vmem:[%s461_s5] ss:$0 sm:$0xff] }
   0x7   :  { %309 = vmatprep.subr.mxu0 %v344_v0  ;;  %320 = vmatprep.subr.mxu1 %v344_v0  ;;  %v126_v20 = vld [vmem:[%s462_s1 + $0x20] sm:$0xff] }
   0x8   :  { %310 = vmatpush3.msra.mxu0 %v25_v4  ;;  %321 = vmatpush3.msra.mxu1 %v128_v9  ;;  %v122_v24 = vld [vmem:[%s462_s1] sm:$0xff] }
   0x9   :  { %311 = vmatprep.subr.mxu0 %v344_v0  ;;  %322 = vmatprep.subr.mxu1 %v344_v0 }
   0xa   :  { %312 = vmatpush3.msra.mxu0 %v24_v5  ;;  %323 = vmatpush3.msra.mxu1 %v127_v10 }
   0xb   :  { %314 = vmatmul.mubr.msk.f32.vlgmr.msra.gmra.mxu0 %vm29_vm1, %v23_v6  ;;  %327 = vmatprep.subr.mxu1 %v344_v0 }
  0x13   :  { %v343_v12 = vpop.eup %342 }
  0xcb   :  { %v99_v13 = vpop.f32.mrf.mxu0 }
  0xcc   :  { %v111_v14 = vmul.f32 %v343_v12, %v99_v13 }
  0xcd   :  { %v315_v16 = vpop.f32.mrf.mxu0 }
  0xce   :  { %v112_v17 = vfloor.f32 %v111_v14 }
  0xd0   :  { %v120_v18 = vadd.f32 %v283_v15, %v112_v17 }
  0xd2   :  { %v121_v19 = vsub.f32 %v120_v18, %v99_v13 }
  0xd4   :  { %325 = vmatmul.mubr.msk.f32.vlgmr.msra.gmra.mxu1 %vm131_vm2, %v121_v19 }
  0xd5   :  { %328 = vmatpush3.msra.mxu1 %v126_v20  ;;  %337 = vmatprep.mubr.msk.f32.mxu1 %vm345_vm0, %v344_v0 }
  0xd6   :  { %329 = vmatprep.subr.mxu1 %v344_v0 }
  0xd7   :  { %330 = vmatpush3.msra.mxu1 %v125_v21 }
  0xd8   :  { %331 = vmatprep.subr.mxu1 %v344_v0 }
  0xd9   :  { %332 = vmatpush3.msra.mxu1 %v124_v22 }
  0xda   :  { %333 = vmatprep.subr.mxu1 %v344_v0 }
  0xdb   :  { %334 = vmatpush3.msra.mxu1 %v123_v23 }
  0xdc   :  { %335 = vmatprep.subr.mxu1 %v344_v0 }
  0xdd   :  { %336 = vmatpush3.msra.mxu1 %v122_v24 }
  0xde   :  { %338 = vmatmul.mubr.msk.f32.vlgmr.msra.gmra.mxu1 %vm29_vm1, %v23_v6 }
 0x194   :  { %v201_v25 = vpop.f32.mrf.mxu1 }
 0x196   :  { %v326_v26 = vpop.f32.mrf.mxu1 }
 0x19e   :  { %v271_v27 = vpop.f32.mrf.mxu1 }
 0x19f   :  { %v272_v28 = vadd.f32 %v271_v27, %v201_v25 }
 0x1a0   :  { %v339_v29 = vpop.f32.mrf.mxu1 }
 0x1a1   :  { %276 = vst.msk [vmem:[%s463_s6] sm:$0x3] %vm275_vm3, %v272_v28 }

</bundles_post_ra>
